<compile_context>
chip_gen: v7x
topology: tpu7x:2x2x1
jax: 0.10.0
libtpu: 0.0.40
codegen_flags: <defaults>
</compile_context>

<pallas_src>
import functools

import jax
import jax.numpy as jnp
from jax.experimental import pallas as pl
from jax.experimental.pallas import tpu as pltpu


_SELU_ALPHA = 1.6732632423543772
_SELU_SCALE = 1.0507009873554805


def _selu(x):
    # f32 SELU: exp lands on the EUP slot, select/mul on the VPU.
    return _SELU_SCALE * jnp.where(x > 0, x, _SELU_ALPHA * (jnp.exp(x) - 1.0))


def _koopman_fwd_kernel(x_ref,
                        w1, b1, w2, b2, w3, b3,   # encoder
                        w4, b4, w5, b5, w6, b6,   # decoder (Koopman fused in w4/b4)
                        o_ref):
    def layer(h, w, b, activate):
        y = jnp.dot(h.astype(jnp.bfloat16), w[...],
                    preferred_element_type=jnp.float32) + b[...]
        return _selu(y) if activate else y

    h = layer(x_ref[...].astype(jnp.float32), w1, b1, True)
    h = layer(h, w2, b2, True)
    z = layer(h, w3, b3, True)          # zk (latent)
    # zk1 = zk @ Wd.T + bd is fused into (w4, b4) on the host side.
    h = layer(z, w4, b4, True)
    h = layer(h, w5, b5, True)
    y = layer(h, w6, b6, False)
    o_ref[...] = y.astype(o_ref.dtype)


def prepare_koopman_params(params):
    """One-time layout prep.

    `params` is a list of (weight, bias) pairs in torch nn.Linear layout
    (weight: (out, in), bias: (out,)), ordered: 3 encoder layers,
    linear_dynamics, 3 decoder layers.

    Returns a flat tuple of arrays for the kernel: weights transposed to
    (in, out) and cast to bf16 (MXU operand dtype), biases reshaped to
    (1, out) in f32, with linear_dynamics algebraically fused into the
    decoder's first layer.
    """
    p = [(jnp.asarray(w, jnp.float32), jnp.asarray(b, jnp.float32)) for w, b in params]
    (w1, b1), (w2, b2), (w3, b3), (wd, bd), (w4, b4), (w5, b5), (w6, b6) = p

    # z1 = z @ Wd.T + bd ; h_pre = z1 @ W4.T + b4
    #   => h_pre = z @ (Wd.T @ W4.T) + (bd @ W4.T + b4)   (exact, no nonlinearity between)
    w4f_t = wd.T @ w4.T                 # (latent, layers[-1])
    b4f = bd @ w4.T + b4

    mats = [w1.T, w2.T, w3.T, w4f_t, w5.T, w6.T]
    biases = [b1, b2, b3, b4f, b5, b6]

    flat = []
    for m, b in zip(mats, biases):
        flat.append(m.astype(jnp.bfloat16))
        flat.append(b.reshape(1, -1).astype(jnp.float32))
    return tuple(flat)


@functools.partial(jax.jit, static_argnames=("batch_tile",))
def deep_koopman_ae_forward(x, flat_params, *, batch_tile=None):
    """DeepKoopmanAE.forward: decoder(linear_dynamics(encoder(x))) as one kernel."""
    B, in_size = x.shape
    out_size = flat_params[-1].shape[-1]

    if batch_tile is None:
        if B >= 256 and B % 2 == 0:
            # Large batch: big tiles (amortize ~0.35us/step, fill MXU M dim) but
            # keep >= 2 grid steps so v7x's two TensorCores both get work.
            cands = [t for t in (1024, 512, 256, 128) if t < B and B % t == 0]
            batch_tile = cands[0] if cands else B
        else:
            batch_tile = B
    assert B % batch_tile == 0, "batch must be a multiple of batch_tile"
    grid = (B // batch_tile,)

    in_specs = [pl.BlockSpec((batch_tile, in_size), lambda i: (i, 0))]
    for a in flat_params:
        # Full-array blocks, constant index_map -> weights stay VMEM-resident.
        in_specs.append(pl.BlockSpec(a.shape, lambda i: (0, 0)))

    return pl.pallas_call(
        _koopman_fwd_kernel,
        out_shape=jax.ShapeDtypeStruct((B, out_size), x.dtype),
        grid=grid,
        in_specs=in_specs,
        out_specs=pl.BlockSpec((batch_tile, out_size), lambda i: (i, 0)),
        compiler_params=pltpu.CompilerParams(
            dimension_semantics=("parallel",),
        ),
    )(x, *flat_params)


# ----------------------------- reference + demo -----------------------------

def _ref_forward(x, params):
    def lin(v, w, b):
        return v @ w.T + b
    (w1, b1), (w2, b2), (w3, b3), (wd, bd), (w4, b4), (w5, b5), (w6, b6) = params
    h = _selu(lin(x, w1, b1))
    h = _selu(lin(h, w2, b2))
    z = _selu(lin(h, w3, b3))
    z1 = lin(z, wd, bd)
    h = _selu(lin(z1, w4, b4))
    h = _selu(lin(h, w5, b5))
    return lin(h, w6, b6)


def _init_linear(key, fan_in, fan_out):
    # xavier_uniform_ for weights (as in init_all_weights), torch-default bias.
    kw, kb = jax.random.split(key)
    limit = (6.0 / (fan_in + fan_out)) ** 0.5
    w = jax.random.uniform(kw, (fan_out, fan_in), jnp.float32, -limit, limit)
    bb = 1.0 / (fan_in ** 0.5)
    b = jax.random.uniform(kb, (fan_out,), jnp.float32, -bb, bb)
    return w, b


if __name__ == "__main__":
    input_size = 32
    output_size = 32
    layers = [256, 64]
    latent_dim = 16
    batch = 8

    key = jax.random.PRNGKey(0)

    enc_dims = [input_size] + layers + [latent_dim]
    dec_dims = [latent_dim] + layers[::-1] + [output_size]

    params = []
    k = key
    for din, dout in zip(enc_dims[:-1], enc_dims[1:]):        # encoder
        k, sub = jax.random.split(k)
        params.append(_init_linear(sub, din, dout))
    k, sub = jax.random.split(k)                              # linear_dynamics
    params.append(_init_linear(sub, latent_dim, latent_dim))
    for din, dout in zip(dec_dims[:-1], dec_dims[1:]):        # decoder
        k, sub = jax.random.split(k)
        params.append(_init_linear(sub, din, dout))

    k, sub = jax.random.split(k)
    x = jax.random.normal(sub, (batch, input_size), dtype=jnp.float32)

    flat = prepare_koopman_params(params)            # one-time layout plumbing
    y = jax.block_until_ready(deep_koopman_ae_forward(x, flat))

    y_ref = _ref_forward(x, params)
    assert y.shape == (batch, output_size)
    # bf16 MXU operands (f32 accumulation): tolerance loosened vs f32 reference.
    max_err = float(jnp.max(jnp.abs(y - y_ref)))
    assert jnp.allclose(y, y_ref, atol=5e-2, rtol=5e-2), max_err

    print("KERNEL_OK")
</pallas_src>

<mosaic_0001>
module attributes {stable_mosaic.version = 11 : i64} {
  func.func @_koopman_fwd_kernel(%arg0: i32, %arg1: memref<8x32xf32, #tpu.memory_space<vmem>>, %arg2: memref<32x256xbf16, #tpu.memory_space<vmem>>, %arg3: memref<1x256xf32, #tpu.memory_space<vmem>>, %arg4: memref<256x64xbf16, #tpu.memory_space<vmem>>, %arg5: memref<1x64xf32, #tpu.memory_space<vmem>>, %arg6: memref<64x16xbf16, #tpu.memory_space<vmem>>, %arg7: memref<1x16xf32, #tpu.memory_space<vmem>>, %arg8: memref<16x64xbf16, #tpu.memory_space<vmem>>, %arg9: memref<1x64xf32, #tpu.memory_space<vmem>>, %arg10: memref<64x256xbf16, #tpu.memory_space<vmem>>, %arg11: memref<1x256xf32, #tpu.memory_space<vmem>>, %arg12: memref<256x32xbf16, #tpu.memory_space<vmem>>, %arg13: memref<1x32xf32, #tpu.memory_space<vmem>>, %arg14: memref<8x32xf32, #tpu.memory_space<vmem>>) attributes {dimension_semantics = [#tpu.dimension_semantics<parallel>], iteration_bounds = array<i64: 1>, scalar_prefetch = 0 : i64, scratch_operands = 0 : i64, tpu.core_type = #tpu.core_type<tc>, window_params = [{transform_indices = @transform_0, window_bounds = array<i64: 8, 32>}, {pipeline_mode = #tpu.pipeline_mode<synchronous>, transform_indices = @transform_1, window_bounds = array<i64: 32, 256>}, {pipeline_mode = #tpu.pipeline_mode<synchronous>, transform_indices = @transform_2, window_bounds = array<i64: 1, 256>}, {pipeline_mode = #tpu.pipeline_mode<synchronous>, transform_indices = @transform_3, window_bounds = array<i64: 256, 64>}, {pipeline_mode = #tpu.pipeline_mode<synchronous>, transform_indices = @transform_4, window_bounds = array<i64: 1, 64>}, {pipeline_mode = #tpu.pipeline_mode<synchronous>, transform_indices = @transform_5, window_bounds = array<i64: 64, 16>}, {pipeline_mode = #tpu.pipeline_mode<synchronous>, transform_indices = @transform_6, window_bounds = array<i64: 1, 16>}, {pipeline_mode = #tpu.pipeline_mode<synchronous>, transform_indices = @transform_7, window_bounds = array<i64: 16, 64>}, {pipeline_mode = #tpu.pipeline_mode<synchronous>, transform_indices = @transform_8, window_bounds = array<i64: 1, 64>}, {pipeline_mode = #tpu.pipeline_mode<synchronous>, transform_indices = @transform_9, window_bounds = array<i64: 64, 256>}, {pipeline_mode = #tpu.pipeline_mode<synchronous>, transform_indices = @transform_10, window_bounds = array<i64: 1, 256>}, {pipeline_mode = #tpu.pipeline_mode<synchronous>, transform_indices = @transform_11, window_bounds = array<i64: 256, 32>}, {pipeline_mode = #tpu.pipeline_mode<synchronous>, transform_indices = @transform_12, window_bounds = array<i64: 1, 32>}, {transform_indices = @transform_13, window_bounds = array<i64: 8, 32>}]} {
    %c0 = arith.constant 0 : index
    %c0_0 = arith.constant 0 : index
    %0 = vector.load %arg1[%c0, %c0_0] : memref<8x32xf32, #tpu.memory_space<vmem>>, vector<8x32xf32>
    %1 = arith.truncf %0 : vector<8x32xf32> to vector<8x32xbf16>
    %c0_1 = arith.constant 0 : index
    %c0_2 = arith.constant 0 : index
    %2 = vector.load %arg2[%c0_1, %c0_2] : memref<32x256xbf16, #tpu.memory_space<vmem>>, vector<32x256xbf16>
    %cst = arith.constant dense<0.000000e+00> : vector<8x256xf32>
    %3 = tpu.matmul %1, %2, %cst {dimension_numbers = #tpu.dot_dimension_numbers<[1], [0], [0], [1], [0, 0, 1, 1], [], []>} : vector<8x32xbf16>, vector<32x256xbf16>, vector<8x256xf32> -> vector<8x256xf32>
    %c0_3 = arith.constant 0 : index
    %c0_4 = arith.constant 0 : index
    %4 = vector.load %arg3[%c0_3, %c0_4] : memref<1x256xf32, #tpu.memory_space<vmem>>, vector<1x256xf32>
    %5 = vector.broadcast %4 : vector<1x256xf32> to vector<8x256xf32>
    %6 = arith.addf %3, %5 : vector<8x256xf32>
    %cst_5 = arith.constant 0.000000e+00 : f32
    %7 = vector.broadcast %cst_5 : f32 to vector<8x256xf32>
    %8 = arith.cmpf ogt, %6, %7 : vector<8x256xf32>
    %9 = math.exp %6 : vector<8x256xf32>
    %cst_6 = arith.constant 1.000000e+00 : f32
    %10 = vector.broadcast %cst_6 : f32 to vector<8x256xf32>
    %11 = arith.subf %9, %10 : vector<8x256xf32>
    %cst_7 = arith.constant 1.67326319 : f32
    %12 = vector.broadcast %cst_7 : f32 to vector<8x256xf32>
    %13 = arith.mulf %12, %11 : vector<8x256xf32>
    %14 = arith.select %8, %6, %13 : vector<8x256xi1>, vector<8x256xf32>
    %cst_8 = arith.constant 1.05070102 : f32
    %15 = vector.broadcast %cst_8 : f32 to vector<8x256xf32>
    %16 = arith.mulf %15, %14 : vector<8x256xf32>
    %17 = arith.truncf %16 : vector<8x256xf32> to vector<8x256xbf16>
    %c0_9 = arith.constant 0 : index
    %c0_10 = arith.constant 0 : index
    %18 = vector.load %arg4[%c0_9, %c0_10] : memref<256x64xbf16, #tpu.memory_space<vmem>>, vector<256x64xbf16>
    %cst_11 = arith.constant dense<0.000000e+00> : vector<8x64xf32>
    %19 = tpu.matmul %17, %18, %cst_11 {dimension_numbers = #tpu.dot_dimension_numbers<[1], [0], [0], [1], [0, 0, 1, 1], [], []>} : vector<8x256xbf16>, vector<256x64xbf16>, vector<8x64xf32> -> vector<8x64xf32>
    %c0_12 = arith.constant 0 : index
    %c0_13 = arith.constant 0 : index
    %20 = vector.load %arg5[%c0_12, %c0_13] : memref<1x64xf32, #tpu.memory_space<vmem>>, vector<1x64xf32>
    %21 = vector.broadcast %20 : vector<1x64xf32> to vector<8x64xf32>
    %22 = arith.addf %19, %21 : vector<8x64xf32>
    %cst_14 = arith.constant 0.000000e+00 : f32
    %23 = vector.broadcast %cst_14 : f32 to vector<8x64xf32>
    %24 = arith.cmpf ogt, %22, %23 : vector<8x64xf32>
    %25 = math.exp %22 : vector<8x64xf32>
    %cst_15 = arith.constant 1.000000e+00 : f32
    %26 = vector.broadcast %cst_15 : f32 to vector<8x64xf32>
    %27 = arith.subf %25, %26 : vector<8x64xf32>
    %cst_16 = arith.constant 1.67326319 : f32
    %28 = vector.broadcast %cst_16 : f32 to vector<8x64xf32>
    %29 = arith.mulf %28, %27 : vector<8x64xf32>
    %30 = arith.select %24, %22, %29 : vector<8x64xi1>, vector<8x64xf32>
    %cst_17 = arith.constant 1.05070102 : f32
    %31 = vector.broadcast %cst_17 : f32 to vector<8x64xf32>
    %32 = arith.mulf %31, %30 : vector<8x64xf32>
    %33 = arith.truncf %32 : vector<8x64xf32> to vector<8x64xbf16>
    %c0_18 = arith.constant 0 : index
    %c0_19 = arith.constant 0 : index
    %34 = vector.load %arg6[%c0_18, %c0_19] : memref<64x16xbf16, #tpu.memory_space<vmem>>, vector<64x16xbf16>
    %cst_20 = arith.constant dense<0.000000e+00> : vector<8x16xf32>
    %35 = tpu.matmul %33, %34, %cst_20 {dimension_numbers = #tpu.dot_dimension_numbers<[1], [0], [0], [1], [0, 0, 1, 1], [], []>} : vector<8x64xbf16>, vector<64x16xbf16>, vector<8x16xf32> -> vector<8x16xf32>
    %c0_21 = arith.constant 0 : index
    %c0_22 = arith.constant 0 : index
    %36 = vector.load %arg7[%c0_21, %c0_22] : memref<1x16xf32, #tpu.memory_space<vmem>>, vector<1x16xf32>
    %37 = vector.broadcast %36 : vector<1x16xf32> to vector<8x16xf32>
    %38 = arith.addf %35, %37 : vector<8x16xf32>
    %cst_23 = arith.constant 0.000000e+00 : f32
    %39 = vector.broadcast %cst_23 : f32 to vector<8x16xf32>
    %40 = arith.cmpf ogt, %38, %39 : vector<8x16xf32>
    %41 = math.exp %38 : vector<8x16xf32>
    %cst_24 = arith.constant 1.000000e+00 : f32
    %42 = vector.broadcast %cst_24 : f32 to vector<8x16xf32>
    %43 = arith.subf %41, %42 : vector<8x16xf32>
    %cst_25 = arith.constant 1.67326319 : f32
    %44 = vector.broadcast %cst_25 : f32 to vector<8x16xf32>
    %45 = arith.mulf %44, %43 : vector<8x16xf32>
    %46 = arith.select %40, %38, %45 : vector<8x16xi1>, vector<8x16xf32>
    %cst_26 = arith.constant 1.05070102 : f32
    %47 = vector.broadcast %cst_26 : f32 to vector<8x16xf32>
    %48 = arith.mulf %47, %46 : vector<8x16xf32>
    %49 = arith.truncf %48 : vector<8x16xf32> to vector<8x16xbf16>
    %c0_27 = arith.constant 0 : index
    %c0_28 = arith.constant 0 : index
    %50 = vector.load %arg8[%c0_27, %c0_28] : memref<16x64xbf16, #tpu.memory_space<vmem>>, vector<16x64xbf16>
    %cst_29 = arith.constant dense<0.000000e+00> : vector<8x64xf32>
    %51 = tpu.matmul %49, %50, %cst_29 {dimension_numbers = #tpu.dot_dimension_numbers<[1], [0], [0], [1], [0, 0, 1, 1], [], []>} : vector<8x16xbf16>, vector<16x64xbf16>, vector<8x64xf32> -> vector<8x64xf32>
    %c0_30 = arith.constant 0 : index
    %c0_31 = arith.constant 0 : index
    %52 = vector.load %arg9[%c0_30, %c0_31] : memref<1x64xf32, #tpu.memory_space<vmem>>, vector<1x64xf32>
    %53 = vector.broadcast %52 : vector<1x64xf32> to vector<8x64xf32>
    %54 = arith.addf %51, %53 : vector<8x64xf32>
    %cst_32 = arith.constant 0.000000e+00 : f32
    %55 = vector.broadcast %cst_32 : f32 to vector<8x64xf32>
    %56 = arith.cmpf ogt, %54, %55 : vector<8x64xf32>
    %57 = math.exp %54 : vector<8x64xf32>
    %cst_33 = arith.constant 1.000000e+00 : f32
    %58 = vector.broadcast %cst_33 : f32 to vector<8x64xf32>
    %59 = arith.subf %57, %58 : vector<8x64xf32>
    %cst_34 = arith.constant 1.67326319 : f32
    %60 = vector.broadcast %cst_34 : f32 to vector<8x64xf32>
    %61 = arith.mulf %60, %59 : vector<8x64xf32>
    %62 = arith.select %56, %54, %61 : vector<8x64xi1>, vector<8x64xf32>
    %cst_35 = arith.constant 1.05070102 : f32
    %63 = vector.broadcast %cst_35 : f32 to vector<8x64xf32>
    %64 = arith.mulf %63, %62 : vector<8x64xf32>
    %65 = arith.truncf %64 : vector<8x64xf32> to vector<8x64xbf16>
    %c0_36 = arith.constant 0 : index
    %c0_37 = arith.constant 0 : index
    %66 = vector.load %arg10[%c0_36, %c0_37] : memref<64x256xbf16, #tpu.memory_space<vmem>>, vector<64x256xbf16>
    %cst_38 = arith.constant dense<0.000000e+00> : vector<8x256xf32>
    %67 = tpu.matmul %65, %66, %cst_38 {dimension_numbers = #tpu.dot_dimension_numbers<[1], [0], [0], [1], [0, 0, 1, 1], [], []>} : vector<8x64xbf16>, vector<64x256xbf16>, vector<8x256xf32> -> vector<8x256xf32>
    %c0_39 = arith.constant 0 : index
    %c0_40 = arith.constant 0 : index
    %68 = vector.load %arg11[%c0_39, %c0_40] : memref<1x256xf32, #tpu.memory_space<vmem>>, vector<1x256xf32>
    %69 = vector.broadcast %68 : vector<1x256xf32> to vector<8x256xf32>
    %70 = arith.addf %67, %69 : vector<8x256xf32>
    %cst_41 = arith.constant 0.000000e+00 : f32
    %71 = vector.broadcast %cst_41 : f32 to vector<8x256xf32>
    %72 = arith.cmpf ogt, %70, %71 : vector<8x256xf32>
    %73 = math.exp %70 : vector<8x256xf32>
    %cst_42 = arith.constant 1.000000e+00 : f32
    %74 = vector.broadcast %cst_42 : f32 to vector<8x256xf32>
    %75 = arith.subf %73, %74 : vector<8x256xf32>
    %cst_43 = arith.constant 1.67326319 : f32
    %76 = vector.broadcast %cst_43 : f32 to vector<8x256xf32>
    %77 = arith.mulf %76, %75 : vector<8x256xf32>
    %78 = arith.select %72, %70, %77 : vector<8x256xi1>, vector<8x256xf32>
    %cst_44 = arith.constant 1.05070102 : f32
    %79 = vector.broadcast %cst_44 : f32 to vector<8x256xf32>
    %80 = arith.mulf %79, %78 : vector<8x256xf32>
    %81 = arith.truncf %80 : vector<8x256xf32> to vector<8x256xbf16>
    %c0_45 = arith.constant 0 : index
    %c0_46 = arith.constant 0 : index
    %82 = vector.load %arg12[%c0_45, %c0_46] : memref<256x32xbf16, #tpu.memory_space<vmem>>, vector<256x32xbf16>
    %cst_47 = arith.constant dense<0.000000e+00> : vector<8x32xf32>
    %83 = tpu.matmul %81, %82, %cst_47 {dimension_numbers = #tpu.dot_dimension_numbers<[1], [0], [0], [1], [0, 0, 1, 1], [], []>} : vector<8x256xbf16>, vector<256x32xbf16>, vector<8x32xf32> -> vector<8x32xf32>
    %c0_48 = arith.constant 0 : index
    %c0_49 = arith.constant 0 : index
    %84 = vector.load %arg13[%c0_48, %c0_49] : memref<1x32xf32, #tpu.memory_space<vmem>>, vector<1x32xf32>
    %85 = vector.broadcast %84 : vector<1x32xf32> to vector<8x32xf32>
    %86 = arith.addf %83, %85 : vector<8x32xf32>
    %c0_50 = arith.constant 0 : index
    %c0_51 = arith.constant 0 : index
    %87 = vector.load %arg14[%c0_50, %c0_51] : memref<8x32xf32, #tpu.memory_space<vmem>>, vector<8x32xf32>
    tpu.vector_store %arg14[%c0_50, %c0_51], %86 {strides = array<i32>} : memref<8x32xf32, #tpu.memory_space<vmem>>, vector<8x32xf32>,
    return
  }
  func.func @transform_0(%arg0: i32) -> (i32, i32) {
    %c0_i32 = arith.constant 0 : i32
    %c0_i32_0 = arith.constant 0 : i32
    return %arg0, %c0_i32 : i32, i32
  }
  func.func @transform_1(%arg0: i32) -> (i32, i32) {
    %c0_i32 = arith.constant 0 : i32
    %c0_i32_0 = arith.constant 0 : i32
    %c0_i32_1 = arith.constant 0 : i32
    return %c0_i32, %c0_i32_0 : i32, i32
  }
  func.func @transform_2(%arg0: i32) -> (i32, i32) {
    %c0_i32 = arith.constant 0 : i32
    %c0_i32_0 = arith.constant 0 : i32
    %c0_i32_1 = arith.constant 0 : i32
    return %c0_i32, %c0_i32_0 : i32, i32
  }
  func.func @transform_3(%arg0: i32) -> (i32, i32) {
    %c0_i32 = arith.constant 0 : i32
    %c0_i32_0 = arith.constant 0 : i32
    %c0_i32_1 = arith.constant 0 : i32
    return %c0_i32, %c0_i32_0 : i32, i32
  }
  func.func @transform_4(%arg0: i32) -> (i32, i32) {
    %c0_i32 = arith.constant 0 : i32
    %c0_i32_0 = arith.constant 0 : i32
    %c0_i32_1 = arith.constant 0 : i32
    return %c0_i32, %c0_i32_0 : i32, i32
  }
  func.func @transform_5(%arg0: i32) -> (i32, i32) {
    %c0_i32 = arith.constant 0 : i32
    %c0_i32_0 = arith.constant 0 : i32
    %c0_i32_1 = arith.constant 0 : i32
    return %c0_i32, %c0_i32_0 : i32, i32
  }
  func.func @transform_6(%arg0: i32) -> (i32, i32) {
    %c0_i32 = arith.constant 0 : i32
    %c0_i32_0 = arith.constant 0 : i32
    %c0_i32_1 = arith.constant 0 : i32
    return %c0_i32, %c0_i32_0 : i32, i32
  }
  func.func @transform_7(%arg0: i32) -> (i32, i32) {
    %c0_i32 = arith.constant 0 : i32
    %c0_i32_0 = arith.constant 0 : i32
    %c0_i32_1 = arith.constant 0 : i32
    return %c0_i32, %c0_i32_0 : i32, i32
  }
  func.func @transform_8(%arg0: i32) -> (i32, i32) {
    %c0_i32 = arith.constant 0 : i32
    %c0_i32_0 = arith.constant 0 : i32
    %c0_i32_1 = arith.constant 0 : i32
    return %c0_i32, %c0_i32_0 : i32, i32
  }
  func.func @transform_9(%arg0: i32) -> (i32, i32) {
    %c0_i32 = arith.constant 0 : i32
    %c0_i32_0 = arith.constant 0 : i32
    %c0_i32_1 = arith.constant 0 : i32
    return %c0_i32, %c0_i32_0 : i32, i32
  }
  func.func @transform_10(%arg0: i32) -> (i32, i32) {
    %c0_i32 = arith.constant 0 : i32
    %c0_i32_0 = arith.constant 0 : i32
    %c0_i32_1 = arith.constant 0 : i32
    return %c0_i32, %c0_i32_0 : i32, i32
  }
  func.func @transform_11(%arg0: i32) -> (i32, i32) {
    %c0_i32 = arith.constant 0 : i32
    %c0_i32_0 = arith.constant 0 : i32
    %c0_i32_1 = arith.constant 0 : i32
    return %c0_i32, %c0_i32_0 : i32, i32
  }
  func.func @transform_12(%arg0: i32) -> (i32, i32) {
    %c0_i32 = arith.constant 0 : i32
    %c0_i32_0 = arith.constant 0 : i32
    %c0_i32_1 = arith.constant 0 : i32
    return %c0_i32, %c0_i32_0 : i32, i32
  }
  func.func @transform_13(%arg0: i32) -> (i32, i32) {
    %c0_i32 = arith.constant 0 : i32
    %c0_i32_0 = arith.constant 0 : i32
    return %arg0, %c0_i32 : i32, i32
  }
}

</mosaic_0001>

<bundles_post_ra>
// kernel: deep_koopman_ae_forward.1
= control target key start
LH: loop header
LB: loop body
LE: loop exit
PB: predicated region body
PF: predicated region fallthrough
CT: control target
= control target key end

     0   :  { %v1026_v2 = vmov 0   ;;  %vm84_vm0 = vcmask 261120   ;;  %s1300_s0 = inlined_call_operand.vmem [shape: f32[8,32], index: 0, kind: input, shape index: {}]   ;;  %s1301_s1 = inlined_call_operand.vmem [shape: bf16[32,256], index: 1, kind: input, shape index: {}]   ;;  %s1302_s2 = inlined_call_operand.vmem [shape: f32[1,256], index: 2, kind: input, shape index: {}]   ;;  %s1303_s3 = inlined_call_operand.vmem [shape: bf16[256,64], index: 3, kind: input, shape index: {}]   ;;  %s1304_s4 = inlined_call_operand.vmem [shape: f32[1,64], index: 4, kind: input, shape index: {}]   ;;  %s1305_s5 = inlined_call_operand.vmem [shape: bf16[64,16], index: 5, kind: input, shape index: {}]   ;;  %s1306_s6 = inlined_call_operand.vmem [shape: f32[1,16], index: 6, kind: input, shape index: {}]   ;;  %s1307_s7 = inlined_call_operand.vmem [shape: bf16[16,64], index: 7, kind: input, shape index: {}]   ;;  %s1308_s8 = inlined_call_operand.vmem [shape: f32[1,64], index: 8, kind: input, shape index: {}]   ;;  %s1309_s9 = inlined_call_operand.vmem [shape: bf16[64,256], index: 9, kind: input, shape index: {}]   ;;  %s1310_s10 = inlined_call_operand.vmem [shape: f32[1,256], index: 10, kind: input, shape index: {}]   ;;  %s1311_s11 = inlined_call_operand.vmem [shape: bf16[256,32], index: 11, kind: input, shape index: {}]   ;;  %s1312_s12 = inlined_call_operand.vmem [shape: f32[1,32], index: 12, kind: input, shape index: {}]   ;;  %s1313_s13 = inlined_call_operand.hbm [shape: f32[8,32], index: 13, kind: output, shape index: {}]  }
   0x1   :  { %v933_v0 = vld [vmem:[%s1301_s1 + $0x4] ss:$8 sps:$4 sm:$0xff]   ;;  %v935_v1 = vld [vmem:[%s1301_s1] ss:$8 sps:$4 sm:$0xff]   ;;  %120 = vmatprep.mubr.bf16.mxu0 %v1026_v2  ;;  %v936_v3 = vld [vmem:[%s1301_s1 + $0x14] ss:$8 sps:$4 sm:$0xff]  }
   0x2   :  { %88 = vmatprep.subr.bf16.mxu0 %v933_v0  ;;  %v938_v4 = vld [vmem:[%s1301_s1 + $0x10] ss:$8 sps:$4 sm:$0xff]   ;;  %v46_v5 = vld [vmem:[%s1300_s0] sm:$0xff]  ;;  %v941_v8 = vld [vmem:[%s1303_s3 + $0x48] sm:$0xff]  }
   0x3   :  { %89 = vmatpush1.bf16.msra.mxu0 %v935_v1  ;;  %v939_v6 = vld [vmem:[%s1303_s3 + $0x40] sm:$0xff]   ;;  %v47_v9 = vpack.c.bf16 %v46_v5, %v46_v5 }
   0x4   :  { %90 = vmatprep.subr.bf16.mxu0 %v936_v3  ;;  %v940_v7 = vld [vmem:[%s1303_s3] sm:$0xff]   ;;  %860 = vmatprep.subr.bf16.mxu1 %v939_v6 }
   0x5   :  { %861 = vmatpush3.bf16.msra.mxu1 %v940_v7 }
   0x6   :  { %862 = vmatprep.subr.bf16.mxu1 %v941_v8 }
   0x7   :  { %91 = vmatpush1.bf16.msra.mxu0 %v938_v4 }
   0xa   :  { %800 = vmatmul.mubr.msk.bf16.vlgmr.msra.gmra.mrb[0].mxu0 %vm84_vm0, %v47_v9 }
   0xb   :  { %18 = vsyncpa [#allocation3], 0  ;;  %v942_v10 = vld [vmem:[%s1303_s3 + $0x8] sm:$0xff]   ;;  %v943_v11 = vld [vmem:[%s1303_s3 + $0x50] sm:$0xff]   ;;  %v54_v23 = vlaneseq  ;;  %v1027_v51 = vmov 0.0   ;;  %vm1028_vm3 = vmmov 0  }
   0xc   :  { %863 = vmatpush3.bf16.msra.mxu1 %v942_v10  ;;  %v944_v12 = vld [vmem:[%s1303_s3 + $0x10] sm:$0xff]   ;;  %v945_v13 = vld [vmem:[%s1303_s3 + $0x58] sm:$0xff]   ;;  %v947_v15 = vld [vmem:[%s1303_s3 + $0x60] sm:$0xff]   ;;  %911 = vmatprep.subr.bf16.mxu0 %v1027_v51  ;;  %vm367_vm5 = vcmask 523264   ;;  %vm434_vm7 = vcmask 130048   ;;  %s1029_s23 = smov [#allocation2]  }
   0xd   :  { %864 = vmatprep.subr.bf16.mxu1 %v943_v11  ;;  %v946_v14 = vld [vmem:[%s1303_s3 + $0x18] sm:$0xff]   ;;  %v948_v16 = vld [vmem:[%s1303_s3 + $0x20] sm:$0xff]   ;;  %v949_v17 = vld [vmem:[%s1303_s3 + $0x68] sm:$0xff]   ;;  %v1165_v24 = vshrl.u32 %v54_v23, 7  ;;  %919 = vmatprep.mubr.msk.bf16.mxu0 %vm1028_vm3, %v1027_v51 }
   0xe   :  { %v950_v18 = vld [vmem:[%s1303_s3 + $0x28] sm:$0xff]   ;;  %v951_v19 = vld [vmem:[%s1303_s3 + $0x70] sm:$0xff]   ;;  %v953_v21 = vld [vmem:[%s1303_s3 + $0x78] sm:$0xff]  }
   0xf   :  { %v952_v20 = vld [vmem:[%s1303_s3 + $0x30] sm:$0xff]   ;;  %v954_v22 = vld [vmem:[%s1303_s3 + $0x38] sm:$0xff]   ;;  %v56_v25 = vsub.s32 0, %v1165_v24  ;;  %v52_v26 = vld [vmem:[%s1302_s2] sm:$0x3]  ;;  %v60_v27 = vsub.s32 1, %v1165_v24 }
  0x10   :  { %865 = vmatpush3.bf16.msra.mxu1 %v944_v12  ;;  %v955_v50 = vld [vmem:[%s1305_s5] sm:$0xff]   ;;  %v956_v52 = vld [vmem:[%s1305_s5 + $0x8] sm:$0xff]   ;;  %v957_v53 = vld [vmem:[%s1305_s5 + $0x10] sm:$0xff]  }
  0x11   :  { %866 = vmatprep.subr.bf16.mxu1 %v945_v13  ;;  %v57_v28 = vrot.slane %v52_v26, %v56_v25  ;;  %v61_v29 = vrot.slane %v52_v26, %v60_v27  ;;  %912 = vmatpush3.bf16.msra.mxu0 %v955_v50  ;;  %v958_v54 = vld [vmem:[%s1305_s5 + $0x18] sm:$0xff]   ;;  %v803_v56 = vld [vmem:[%s1304_s4] ss:$0 sm:$0xff] }
  0x12   :  { %913 = vmatprep.subr.bf16.mxu0 %v1027_v51  ;;  %v959_v6 = vld [vmem:[%s1307_s7] sm:$0xff]   ;;  %v963_v23 = vld [vmem:[%s1309_s9 + $0x10] ss:$8 sps:$4 sm:$0xff]  }
  0x13   :  { %v821_v7 = vld [vmem:[%s1306_s6] ss:$0 sm:$0xff]  ;;  %v979_v50 = vld [vmem:[%s1311_s11 + $0x18] sm:$0xff]  }
  0x14   :  { %867 = vmatpush3.bf16.msra.mxu1 %v946_v14  ;;  %v966_v26 = vld [vmem:[%s1309_s9 + $0x20] ss:$8 sps:$4 sm:$0xff]  }
  0x15   :  { %868 = vmatprep.subr.bf16.mxu1 %v947_v15  ;;  %914 = vmatpush3.bf16.msra.mxu0 %v956_v52  ;;  %v981_v52 = vld [vmem:[%s1311_s11 + $0x20] sm:$0xff]  }
  0x16   :  { %915 = vmatprep.subr.bf16.mxu0 %v1027_v51 }
  0x18   :  { %869 = vmatpush3.bf16.msra.mxu1 %v948_v16 }
  0x19   :  { %870 = vmatprep.subr.bf16.mxu1 %v949_v17  ;;  %916 = vmatpush3.bf16.msra.mxu0 %v957_v53  ;;  %v982_v53 = vld [vmem:[%s1311_s11 + $0x68] sm:$0xff]  }
  0x1a   :  { %917 = vmatprep.subr.bf16.mxu0 %v1027_v51 }
  0x1c   :  { %871 = vmatpush3.bf16.msra.mxu1 %v950_v18 }
  0x1d   :  { %872 = vmatprep.subr.bf16.mxu1 %v951_v19  ;;  %918 = vmatpush3.bf16.msra.mxu0 %v958_v54  ;;  %v983_v54 = vld [vmem:[%s1311_s11 + $0x28] sm:$0xff]  }
  0x1e   :  { %923 = vmatprep.subr.bf16.mxu0 %v1027_v51 }
  0x20   :  { %873 = vmatpush3.bf16.msra.mxu1 %v952_v20  ;;  %v962_v20 = vld [vmem:[%s1309_s9 + $0x4] ss:$8 sps:$4 sm:$0xff]  }
  0x21   :  { %874 = vmatprep.subr.bf16.mxu1 %v953_v21  ;;  %v960_v21 = vld [vmem:[%s1309_s9] ss:$8 sps:$4 sm:$0xff]  }
  0x24   :  { %875 = vmatpush3.bf16.msra.mxu1 %v954_v22  ;;  %v965_v22 = vld [vmem:[%s1309_s9 + $0x14] ss:$8 sps:$4 sm:$0xff]  }
  0xdd   :  { %v122_v30 = vpop.f32.mrb[0].mxu0 }
  0xde   :  { %v123_v31 = vadd.f32 %v122_v30, %v57_v28  ;;  %v124_v32 = vpop.f32.mrb[1].mxu0  ;;  %v971_v28 = vld [vmem:[%s1309_s9 + $0x34] ss:$8 sps:$4 sm:$0xff]   ;;  %v972_v30 = vld [vmem:[%s1311_s11 + $0x40] sm:$0xff]  }
  0xdf   :  { %v125_v33 = vadd.f32 %v124_v32, %v61_v29  ;;  %v126_v34 = vpop.f32.mrb[2].mxu0  ;;  %v969_v29 = vld [vmem:[%s1309_s9 + $0x30] ss:$8 sps:$4 sm:$0xff]   ;;  %v974_v32 = vld [vmem:[%s1311_s11 + $0x48] sm:$0xff]   ;;  %889 = vmatprep.subr.bf16.mxu1 %v972_v30 }
  0xe0   :  { %v131_v35 = vmul.f32 1.442695, %v123_v31  ;;  %v127_v36 = vpop.f32.mrb[3].mxu0  ;;  %vm129_vm1 = vcmp.gt.f32.partialorder %v123_v31, 0.0 }
  0xe1   :  { %v133_v37 = vmul.f32 1.442695, %v125_v33  ;;  %vm130_vm2 = vcmp.gt.f32.partialorder %v125_v33, 0.0 }
  0xe2   :  { %988 = vpow2.f32 %v131_v35 }
  0xe3   :  { %990 = vpow2.f32 %v133_v37 }
  0xec   :  { %v989_v38 = vpop.eup %988 }
  0xed   :  { %v991_v39 = vpop.eup %990  ;;  %v801_v40 = vadd.f32 -1.0, %v989_v38 }
  0xee   :  { %v802_v41 = vadd.f32 -1.0, %v991_v39 }
  0xef   :  { %v137_v42 = vmul.f32 1.6732632, %v801_v40 }
  0xf0   :  { %v138_v43 = vmul.f32 1.6732632, %v802_v41 }
  0xf1   :  { %v139_v44 = vsel %vm129_vm1, %v123_v31, %v137_v42  ;;  %v973_v31 = vld [vmem:[%s1311_s11] sm:$0xff]  }
  0xf2   :  { %v140_v45 = vsel %vm130_vm2, %v125_v33, %v138_v43  ;;  %v141_v46 = vmul.f32 1.050701, %v139_v44  ;;  %v828_v33 = vld [vmem:[%s1308_s8] ss:$0 sm:$0xff]  ;;  %s788_s8 = sshll.u32 %s1029_s23, 4  ;;  %s789_s8 = int_to_ptr.vmem [resolvable:$true] %s788_s8 }
  0xf3   :  { %v142_v47 = vmul.f32 1.050701, %v140_v45  ;;  %s1002_s7 = scalar_lea.vmem %s789_s8, 128  ;;  %p1007_p1 = scmp.lt.s32.totalorder %s789_s8, %s789_s8 }
  0xf4   :  { %v143_v49 = vpack.c.bf16 %v141_v46, %v141_v46  ;;  %v975_v46 = vld [vmem:[%s1311_s11 + $0x8] sm:$0xff]   ;;  %p1003_p0 = scmp.ne.s32.totalorder %s789_s8, %s1002_s7  ;;  %p1008_p2 = scmp.lt.s32.totalorder %s1002_s7, %s1002_s7 }
  0xf5   :  { %v144_v48 = vpack.c.bf16 %v142_v47, %v142_v47  ;;  %v976_v47 = vld [vmem:[%s1311_s11 + $0x50] sm:$0xff]  }
  0xf6   :  { %p1009_p3 = por %p1008_p2, %p1007_p1 }
  0xf7   :  { %312 = vmatprep.mubr.bf16.mxu1 %v144_v48  ;;  %v977_v48 = vld [vmem:[%s1311_s11 + $0x10] sm:$0xff]  }
  0xf8   :  { %313 = vmatmul.mubr.bf16.vlgmr.msra.gmra.mrb[0].mxu1 %v143_v49  ;;  %v978_v49 = vld [vmem:[%s1311_s11 + $0x58] sm:$0xff]   ;;  %p1010_p4 = pnand %p1009_p3, %p1003_p0 }
  0xf9   :  { %890 = vmatpush3.bf16.msra.mxu1 %v973_v31 }
  0xfa   :  { %891 = vmatprep.subr.bf16.mxu1 %v974_v32 }
  0xfd   :  { %892 = vmatpush3.bf16.msra.mxu1 %v975_v46 }
  0xfe   :  { %893 = vmatprep.subr.bf16.mxu1 %v976_v47 }
 0x101   :  { %894 = vmatpush3.bf16.msra.mxu1 %v977_v48 }
 0x102   :  { %895 = vmatprep.subr.bf16.mxu1 %v978_v49 }
 0x105   :  { %896 = vmatpush3.bf16.msra.mxu1 %v979_v50 }
 0x1cb   :  { %v876_v55 = vpop.f32.mrb[0].mxu1 }
 0x1cc   :  { %v877_v57 = vpop.f32.mrb[1].mxu1 }
 0x1cd   :  { %v878_v58 = vadd.f32 %v877_v57, %v876_v55  ;;  %v879_v59 = vpop.f32.mrb[2].mxu1  ;;  %v984_v55 = vld [vmem:[%s1311_s11 + $0x70] sm:$0xff]   ;;  %v986_v57 = vld [vmem:[%s1311_s11 + $0x78] sm:$0xff]  }
 0x1ce   :  { %v880_v60 = vpop.f32.mrb[3].mxu1  ;;  %v494_v59 = vld [vmem:[%s1310_s10] sm:$0x3] }
 0x1cf   :  { %v315_v61 = vadd.f32 %v878_v58, %v803_v56  ;;  %v985_v56 = vld [vmem:[%s1311_s11 + $0x30] sm:$0xff]   ;;  %v987_v58 = vld [vmem:[%s1311_s11 + $0x38] sm:$0xff]   ;;  %v499_v60 = vrot.slane %v494_v59, %v56_v25 }
 0x1d1   :  { %v321_v62 = vmul.f32 1.442695, %v315_v61  ;;  %vm320_vm4 = vcmp.gt.f32.partialorder %v315_v61, 0.0 }
 0x1d3   :  { %992 = vpow2.f32 %v321_v62 }
 0x1dd   :  { %v993_v63 = vpop.eup %992 }
 0x1de   :  { %v820_v0 = vadd.f32 -1.0, %v993_v63 }
 0x1e0   :  { %v324_v1 = vmul.f32 1.6732632, %v820_v0 }
 0x1e2   :  { %v325_v3 = vsel %vm320_vm4, %v315_v61, %v324_v1  ;;  %v503_v61 = vrot.slane %v494_v59, %v60_v27 }
 0x1e3   :  { %v326_v4 = vmul.f32 1.050701, %v325_v3 }
 0x1e5   :  { %v327_v5 = vpack.c.bf16 %v326_v4, %v326_v4 }
 0x1e7   :  { %920 = vmatmul.mubr.msk.bf16.vlgmr.msra.gmra.mrb[4].mxu0 %vm367_vm5, %v327_v5 }
 0x1e8   :  { %925 = vmatprep.mubr.msk.bf16.mxu0 %vm1028_vm3, %v1027_v51  ;;  %924 = vmatpush3.bf16.msra.mxu0 %v959_v6  ;;  %v980_v51 = vld [vmem:[%s1311_s11 + $0x60] sm:$0xff]  }
 0x1e9   :  { %549 = vmatprep.subr.bf16.mxu0 %v962_v20  ;;  %897 = vmatprep.subr.bf16.mxu1 %v980_v51 }
 0x1ea   :  { %898 = vmatpush3.bf16.msra.mxu1 %v981_v52 }
 0x1eb   :  { %899 = vmatprep.subr.bf16.mxu1 %v982_v53 }
 0x1ee   :  { %900 = vmatpush3.bf16.msra.mxu1 %v983_v54 }
 0x1ef   :  { %901 = vmatprep.subr.bf16.mxu1 %v984_v55 }
 0x1f2   :  { %902 = vmatpush3.bf16.msra.mxu1 %v985_v56 }
 0x1f3   :  { %903 = vmatprep.subr.bf16.mxu1 %v986_v57 }
 0x1f6   :  { %904 = vmatpush3.bf16.msra.mxu1 %v987_v58 }
 0x2ba   :  { %v405_v8 = vpop.f32.mrb[4].mxu0 }
 0x2bb   :  { %v406_v9 = vadd.f32 %v821_v7, %v405_v8  ;;  %v921_v10 = vpop.f32.mrb[5].mxu0 }
 0x2bc   :  { %v408_v11 = vpop.f32.mrb[6].mxu0 }
 0x2bd   :  { %v412_v12 = vmul.f32 1.442695, %v406_v9  ;;  %v922_v13 = vpop.f32.mrb[7].mxu0  ;;  %vm411_vm6 = vcmp.gt.f32.partialorder %v406_v9, 0.0 }
 0x2bf   :  { %994 = vpow2.f32 %v412_v12 }
 0x2c9   :  { %v995_v14 = vpop.eup %994 }
 0x2ca   :  { %v827_v15 = vadd.f32 -1.0, %v995_v14 }
 0x2cc   :  { %v415_v16 = vmul.f32 1.6732632, %v827_v15 }
 0x2ce   :  { %v416_v17 = vsel %vm411_vm6, %v406_v9, %v415_v16 }
 0x2cf   :  { %v417_v18 = vmul.f32 1.050701, %v416_v17  ;;  %v843_v17 = vld [vmem:[%s1312_s12] ss:$0 sm:$0xff] }
 0x2d1   :  { %v418_v19 = vpack.c.bf16 %v417_v18, %v417_v18 }
 0x2d3   :  { %926 = vmatmul.mubr.msk.bf16.vlgmr.msra.gmra.mrb[8].mxu0 %vm434_vm7, %v418_v19 }
 0x2d4   :  { %581 = vmatprep.mubr.bf16.mxu0 %v1026_v2  ;;  %550 = vmatpush1.bf16.msra.mxu0 %v960_v21  ;;  %v968_v2 = vld [vmem:[%s1309_s9 + $0x24] ss:$8 sps:$4 sm:$0xff]  }
 0x2d5   :  { %551 = vmatprep.subr.bf16.mxu0 %v965_v22 }
 0x2d8   :  { %552 = vmatpush1.bf16.msra.mxu0 %v963_v23 }
 0x2d9   :  { %553 = vmatprep.subr.bf16.mxu0 %v968_v2 }
 0x2dc   :  { %554 = vmatpush1.bf16.msra.mxu0 %v966_v26 }
 0x2dd   :  { %555 = vmatprep.subr.bf16.mxu0 %v971_v28 }
 0x2e0   :  { %556 = vmatpush1.bf16.msra.mxu0 %v969_v29 }
 0x3a6   :  { %v472_v34 = vpop.f32.mrb[8].mxu0 }
 0x3a7   :  { %v473_v35 = vadd.f32 %v828_v33, %v472_v34  ;;  %v927_v36 = vpop.f32.mrb[9].mxu0 }
 0x3a8   :  { %v475_v37 = vpop.f32.mrb[10].mxu0 }
 0x3a9   :  { %v479_v38 = vmul.f32 1.442695, %v473_v35  ;;  %v928_v39 = vpop.f32.mrb[11].mxu0  ;;  %vm478_vm8 = vcmp.gt.f32.partialorder %v473_v35, 0.0 }
 0x3ab   :  { %996 = vpow2.f32 %v479_v38 }
 0x3b5   :  { %v997_v40 = vpop.eup %996 }
 0x3b6   :  { %v831_v41 = vadd.f32 -1.0, %v997_v40 }
 0x3b8   :  { %v482_v42 = vmul.f32 1.6732632, %v831_v41 }
 0x3ba   :  { %v483_v43 = vsel %vm478_vm8, %v473_v35, %v482_v42 }
 0x3bb   :  { %v484_v44 = vmul.f32 1.050701, %v483_v43 }
 0x3bd   :  { %v485_v45 = vpack.c.bf16 %v484_v44, %v484_v44 }
 0x3bf   :  { %840 = vmatmul.mubr.msk.bf16.vlgmr.msra.gmra.mrb[12].mxu0 %vm367_vm5, %v485_v45 }
 0x492   :  { %v583_v62 = vpop.f32.mrb[12].mxu0 }
 0x493   :  { %v584_v63 = vadd.f32 %v583_v62, %v499_v60  ;;  %v585_v0 = vpop.f32.mrb[13].mxu0 }
 0x494   :  { %v586_v1 = vadd.f32 %v585_v0, %v503_v61  ;;  %v587_v3 = vpop.f32.mrb[14].mxu0 }
 0x495   :  { %v592_v4 = vmul.f32 1.442695, %v584_v63  ;;  %v588_v5 = vpop.f32.mrb[15].mxu0  ;;  %vm590_vm9 = vcmp.gt.f32.partialorder %v584_v63, 0.0 }
 0x496   :  { %v594_v6 = vmul.f32 1.442695, %v586_v1  ;;  %vm591_vm10 = vcmp.gt.f32.partialorder %v586_v1, 0.0 }
 0x497   :  { %998 = vpow2.f32 %v592_v4 }
 0x498   :  { %1000 = vpow2.f32 %v594_v6 }
 0x4a1   :  { %v999_v7 = vpop.eup %998 }
 0x4a2   :  { %v1001_v8 = vpop.eup %1000  ;;  %v841_v9 = vadd.f32 -1.0, %v999_v7 }
 0x4a3   :  { %v842_v10 = vadd.f32 -1.0, %v1001_v8 }
 0x4a4   :  { %v598_v11 = vmul.f32 1.6732632, %v841_v9 }
 0x4a5   :  { %v599_v25 = vmul.f32 1.6732632, %v842_v10 }
 0x4a6   :  { %v600_v12 = vsel %vm590_vm9, %v584_v63, %v598_v11 }
 0x4a7   :  { %v602_v24 = vmul.f32 1.050701, %v600_v12  ;;  %v601_v27 = vsel %vm591_vm10, %v586_v1, %v599_v25 }
 0x4a8   :  { %v603_v13 = vmul.f32 1.050701, %v601_v27 }
 0x4a9   :  { %v604_v15 = vpack.c.bf16 %v602_v24, %v602_v24 }
 0x4aa   :  { %v605_v14 = vpack.c.bf16 %v603_v13, %v603_v13 }
 0x4ac   :  { %773 = vmatprep.mubr.bf16.mxu1 %v605_v14 }
 0x4ad   :  { %774 = vmatmul.mubr.bf16.vlgmr.msra.gmra.mrb[4].mxu1 %v604_v15 }
 0x580   :  { %v905_v16 = vpop.f32.mrb[4].mxu1 }
 0x581   :  { %v906_v18 = vpop.f32.mrb[5].mxu1 }
 0x582   :  { %v907_v19 = vadd.f32 %v906_v18, %v905_v16  ;;  %v908_v20 = vpop.f32.mrb[6].mxu1 }
 0x583   :  { %v909_v21 = vpop.f32.mrb[7].mxu1 }
 0x584   :  { %v776_v22 = vadd.f32 %v907_v19, %v843_v17 }
 0x586   :  { %781 = vst.msk [vmem:[#allocation2] sm:$0xff] %vm84_vm0, %v776_v22 }
 0x587   :  { %1013 = shalt.err (!%p1010_p4)
}
 0x588   :  { %s1014_s12 = scalar_lea.hbm %s1313_s13, 128 }
 0x589   :  { %p1015_p5 = scmp.ne.s32.totalorder %s1313_s13, %s1014_s12  ;;  %p1018_p6 = scmp.lt.u32.totalorder %s1014_s12, %s1313_s13 }
 0x58b   :  { %p1020_p7 = pnand %p1018_p6, %p1015_p5 }
 0x58d   :  { %1023 = shalt.err (!%p1020_p7)
}
 0x58e   :  { %791 = dma.vmem_to_hbm [thread:$0]  %s789_s8, 128, %s1313_s13, [#allocation3]  }
 0x58f   :  { %1024 = dma.done.wait [#allocation3], 128  }
 0x590   :  { %1025 = vsyncadd [#allocation3], 4294967168 }
 0x591   :  { %795 = vsyncpa [#allocation3], 1 }

</bundles_post_ra>
